<compile_context>
chip_gen: v7x
topology: tpu7x:2x2x1
jax: 0.10.0
libtpu: 0.0.40
codegen_flags: <defaults>
</compile_context>

<pallas_src>
import math

import jax
import jax.numpy as jnp
import numpy as np
from jax.experimental import pallas as pl
from jax.experimental.pallas import tpu as pltpu

EPS = 1e-06
STD_LOG_MAX = 1.0
STD_LOG_MIN = -10.0


def _round_up(x, m):
    return ((x + m - 1) // m) * m


def make_policy_kernel(num_hidden, dim_action, pad_rows, act_scale, act_bias):
    """num_hidden (Linear+ReLU) layers, split mean/log-std head computed in
    transposed [Da, TB] orientation, Gaussian sample, tanh squash, log-prob.

    Packed (transposed) output layout, rows of a [P, TB] block:
        rows [0, Da)       action
        rows [Da, 2*Da)    squashed mean
        row  2*Da          summed log-prob
        rows [2*Da+1, P)   zero padding (P = round_up(2*Da+1, 8))
    """
    neg_half_log_2pi = -0.5 * math.log(2.0 * math.pi)  # folded at trace time

    def kernel(*refs):
        state_ref, eps_ref = refs[0], refs[1]
        hidden_wb = refs[2:2 + 2 * num_hidden]
        wm_ref, bm_ref, ws_ref, bs_ref = refs[2 + 2 * num_hidden:
                                              2 + 2 * num_hidden + 4]
        out_ref = refs[-1]

        # --- hidden MLP stack (LayerLinear + ReLU), activations kept f32 ---
        h = state_ref[...]
        for i in range(num_hidden):
            w = hidden_wb[2 * i][...]
            b = hidden_wb[2 * i + 1][...]
            h = jnp.maximum(
                jnp.dot(h.astype(w.dtype), w,
                        preferred_element_type=jnp.float32) + b, 0.0)

        # --- split head, computed transposed: [Da, K] x [TB, K] -> [Da, TB]
        # (contract both minor dims, i.e. the q @ k.T MXU pattern) ---
        hm = h.astype(wm_ref.dtype)
        dn = (((1,), (1,)), ((), ()))
        means = jax.lax.dot_general(wm_ref[...], hm, dn,
                                    preferred_element_type=jnp.float32) + bm_ref[...]
        slog = jax.lax.dot_general(ws_ref[...], hm, dn,
                                   preferred_element_type=jnp.float32) + bs_ref[...]

        # --- NetGaussHetero soft clamp of log-std ---
        slog = STD_LOG_MAX - jax.nn.softplus(STD_LOG_MAX - slog)
        slog = STD_LOG_MIN + jax.nn.softplus(slog - STD_LOG_MIN)
        std = jnp.exp(slog)

        # --- Normal(mean, std).rsample() + log_prob ---
        # (action_pre - means) == std * eps exactly -> quadratic term is
        # -0.5 * eps^2 (no divide, no variance).
        eps = eps_ref[...]                      # [Da, TB]
        action_pre = means + std * eps
        log_prob = -0.5 * (eps * eps) - slog + neg_half_log_2pi

        # --- PolicyGauss._project: tanh squash + Jacobian correction ---
        tmp = jnp.tanh(action_pre)
        action = tmp * act_scale + act_bias
        mean_out = jnp.tanh(means) * act_scale + act_bias
        log_prob = log_prob - jnp.log(act_scale * (1.0 - tmp * tmp) + EPS)
        logp_sum = jnp.sum(log_prob, axis=0, keepdims=True)   # [1, TB] sublane reduce

        # --- direct sublane-sliced, lane-dense stores (no concat, no big zeros) ---
        Da = dim_action
        out_ref[0:Da, :] = action
        out_ref[Da:2 * Da, :] = mean_out
        out_ref[2 * Da:2 * Da + 1, :] = logp_sum
        if pad_rows > 0:
            out_ref[2 * Da + 1:, :] = jnp.zeros(
                (pad_rows, action.shape[1]), jnp.float32)

    return kernel


def policy_gauss_forward(state, eps, params, act_scale, act_bias,
                         batch_tile=512, use_bf16_matmul=False):
    """state [B, Ds], eps [B, Da] standard-normal noise,
    params = [W0, b0, ..., Wn, bn] with W [din, dout], b [1, dout]
    (last layer has dout = 2*Da).  Returns (action [B,Da], mean [B,Da],
    prob_log [B,1])."""
    B, Ds = state.shape
    Da = eps.shape[1]
    n_lin = len(params) // 2
    num_hidden = n_lin - 1
    payload = 2 * Da + 1
    P = _round_up(payload, 8)

    # Split final-layer columns into mean / log-std heads, pre-transposed so the
    # kernel computes the head directly in [Da, TB] orientation (no in-kernel
    # lane slicing, no in-kernel transposes).
    w_last, b_last = params[-2], params[-1]
    wdt = jnp.bfloat16 if use_bf16_matmul else jnp.float32
    weight_args = []
    for i in range(num_hidden):
        weight_args += [params[2 * i].astype(wdt), params[2 * i + 1]]
    weight_args += [w_last[:, :Da].T.astype(wdt), b_last[:, :Da].T,
                    w_last[:, Da:].T.astype(wdt), b_last[:, Da:].T]

    # Batch tiling.  The batch is the LANE axis of the eps/output blocks, so a
    # gridded tile must be a multiple of 128; small batches take a single
    # (row-padded to 8) tile instead.
    TBmax = max(128, (batch_tile // 128) * 128)
    if B > 128:
        TB = min(TBmax, _round_up(B, 128))
        if TB > 128 and pl.cdiv(B, TB) < 2:      # give v7x's 2nd TC work
            TB = _round_up(TB // 2, 128)
        Bp = pl.cdiv(B, TB) * TB
    else:
        TB = _round_up(B, 8)
        Bp = TB

    eps_t = eps.T                                # [Da, B]
    if Bp != B:
        state = jnp.pad(state, ((0, Bp - B), (0, 0)))
        eps_t = jnp.pad(eps_t, ((0, 0), (0, Bp - B)))

    kernel = make_policy_kernel(num_hidden, Da, P - payload,
                                float(act_scale), float(act_bias))

    # Weights stay VMEM-resident via constant block index (0, 0).
    weight_specs = [pl.BlockSpec(w.shape, lambda i: (0, 0)) for w in weight_args]

    # Scoped-VMEM budget: resident weights (x2 for buffering) + double-buffered
    # state/eps/out tiles + headroom; capped below v7x's 64 MiB physical VMEM.
    weight_bytes = sum(int(w.size) * w.dtype.itemsize for w in weight_args)
    io_tile_bytes = 4 * (TB * Ds + Da * TB + P * TB)
    vmem_limit = int(min(64 << 20,
                         max(2 * weight_bytes + 4 * io_tile_bytes + (4 << 20),
                             16 << 20)))

    # Advisory cost estimate so XLA schedules the wrapper's split/unpack ops
    # around the custom call.
    flops = 0
    for i in range(n_lin):
        din, dout = params[2 * i].shape
        flops += 2 * B * din * dout
    flops += 40 * B * Da
    bytes_accessed = 4 * (B * Ds + B * Da) + weight_bytes + 4 * P * Bp
    cost = pl.CostEstimate(flops=int(flops), transcendentals=int(9 * B * Da),
                           bytes_accessed=int(bytes_accessed))

    packed = pl.pallas_call(
        kernel,
        out_shape=jax.ShapeDtypeStruct((P, Bp), jnp.float32),
        grid=(Bp // TB,),
        in_specs=[pl.BlockSpec((TB, Ds), lambda i: (i, 0)),   # state tile
                  pl.BlockSpec((Da, TB), lambda i: (0, i))]   # eps (transposed) tile
                 + weight_specs,
        out_specs=pl.BlockSpec((P, TB), lambda i: (0, i)),
        compiler_params=pltpu.CompilerParams(
            dimension_semantics=("parallel",),   # megacore-shard batch axis
            vmem_limit_bytes=vmem_limit),
        cost_estimate=cost,
    )(state, eps_t, *weight_args)

    action = packed[:Da, :B].T
    mean = packed[Da:2 * Da, :B].T
    prob_log = packed[2 * Da:2 * Da + 1, :B].T
    return action, mean, prob_log


def init_params(key, dim_state, dim_action, num_h, dim_h):
    """Deterministic re-implementation of LayerLinear.reset_parameters:
    kaiming_uniform_(a=sqrt(5)) on a (dim_x, dim_y) tensor ->
    U(-1/sqrt(dim_y), 1/sqrt(dim_y)); bias bound uses fan_in = dim_y too."""
    dims = [dim_state] + [dim_h] * num_h + [2 * dim_action]
    params = []
    for i in range(len(dims) - 1):
        din, dout = dims[i], dims[i + 1]
        bound = 1.0 / math.sqrt(dout)
        key, kw, kb = jax.random.split(key, 3)
        w = jax.random.uniform(kw, (din, dout), jnp.float32, -bound, bound)
        b = jax.random.uniform(kb, (1, dout), jnp.float32, -bound, bound)
        params += [w, b]
    return params


def reference_forward(state, eps, params, act_scale, act_bias):
    """Pure-JAX reference of PolicyGauss.forward (ensemble size 1)."""
    h = state
    n = len(params) // 2
    for i in range(n):
        h = h @ params[2 * i] + params[2 * i + 1]
        if i < n - 1:
            h = jnp.maximum(h, 0.0)
    Da = eps.shape[1]
    means = h[:, :Da]
    slog = h[:, Da:]
    slog = STD_LOG_MAX - jax.nn.softplus(STD_LOG_MAX - slog)
    slog = STD_LOG_MIN + jax.nn.softplus(slog - STD_LOG_MIN)
    std = jnp.exp(slog)
    a_pre = means + std * eps
    lp = -((a_pre - means) ** 2) / (2 * std * std) - slog - 0.5 * jnp.log(2 * jnp.pi)
    tmp = jnp.tanh(a_pre)
    action = tmp * act_scale + act_bias
    mean_out = jnp.tanh(means) * act_scale + act_bias
    lp = lp - jnp.log(act_scale * (1.0 - tmp * tmp) + EPS)
    return action, mean_out, jnp.sum(lp, axis=-1, keepdims=True)


if __name__ == "__main__":
    # Small shapes consistent with the module: state [B, dim_state]
    B, dim_state, dim_action = 8, 16, 4
    num_h, dim_h = 2, 32
    bound_low, bound_high = -2.0, 3.0
    act_scale = (bound_high - bound_low) / 2.0
    act_bias = (bound_high + bound_low) / 2.0

    key = jax.random.PRNGKey(0)
    k_state, k_eps, k_params = jax.random.split(key, 3)
    state = jax.random.normal(k_state, (B, dim_state), jnp.float32)
    eps = jax.random.normal(k_eps, (B, dim_action), jnp.float32)  # Normal.rsample noise
    params = init_params(k_params, dim_state, dim_action, num_h, dim_h)

    # Small-batch (single tile) path.
    action, mean, prob_log = policy_gauss_forward(state, eps, params, act_scale, act_bias)
    jax.block_until_ready((action, mean, prob_log))

    a_ref, m_ref, lp_ref = reference_forward(state, eps, params, act_scale, act_bias)
    np.testing.assert_allclose(np.asarray(action), np.asarray(a_ref), rtol=1e-3, atol=1e-3)
    np.testing.assert_allclose(np.asarray(mean), np.asarray(m_ref), rtol=1e-3, atol=1e-3)
    np.testing.assert_allclose(np.asarray(prob_log), np.asarray(lp_ref), rtol=1e-3, atol=1e-3)
    assert action.shape == (B, dim_action)
    assert mean.shape == (B, dim_action)
    assert prob_log.shape == (B, 1)

    # Gridded path: multiple 128-lane batch tiles + row padding.
    B2 = 260
    k_s2, k_e2 = jax.random.split(jax.random.PRNGKey(1))
    state2 = jax.random.normal(k_s2, (B2, dim_state), jnp.float32)
    eps2 = jax.random.normal(k_e2, (B2, dim_action), jnp.float32)
    a2, m2, lp2 = policy_gauss_forward(state2, eps2, params, act_scale, act_bias,
                                       batch_tile=128)
    jax.block_until_ready((a2, m2, lp2))
    a2r, m2r, lp2r = reference_forward(state2, eps2, params, act_scale, act_bias)
    np.testing.assert_allclose(np.asarray(a2), np.asarray(a2r), rtol=1e-3, atol=1e-3)
    np.testing.assert_allclose(np.asarray(m2), np.asarray(m2r), rtol=1e-3, atol=1e-3)
    np.testing.assert_allclose(np.asarray(lp2), np.asarray(lp2r), rtol=1e-3, atol=1e-3)
    assert a2.shape == (B2, dim_action) and lp2.shape == (B2, 1)

    print("KERNEL_OK")
</pallas_src>

<mosaic_0001>
module attributes {stable_mosaic.version = 11 : i64} {
  func.func @kernel(%arg0: i32, %arg1: memref<8x16xf32, #tpu.memory_space<vmem>>, %arg2: memref<4x8xf32, #tpu.memory_space<vmem>>, %arg3: memref<16x32xf32, #tpu.memory_space<vmem>>, %arg4: memref<1x32xf32, #tpu.memory_space<vmem>>, %arg5: memref<32x32xf32, #tpu.memory_space<vmem>>, %arg6: memref<1x32xf32, #tpu.memory_space<vmem>>, %arg7: memref<4x32xf32, #tpu.memory_space<vmem>>, %arg8: memref<4x1xf32, #tpu.memory_space<vmem>>, %arg9: memref<4x32xf32, #tpu.memory_space<vmem>>, %arg10: memref<4x1xf32, #tpu.memory_space<vmem>>, %arg11: memref<16x8xf32, #tpu.memory_space<vmem>>) attributes {dimension_semantics = [#tpu.dimension_semantics<parallel>], iteration_bounds = array<i64: 1>, scalar_prefetch = 0 : i64, scratch_operands = 0 : i64, tpu.core_type = #tpu.core_type<tc>, window_params = [{transform_indices = @transform_0, window_bounds = array<i64: 8, 16>}, {transform_indices = @transform_1, window_bounds = array<i64: 4, 8>}, {pipeline_mode = #tpu.pipeline_mode<synchronous>, transform_indices = @transform_2, window_bounds = array<i64: 16, 32>}, {pipeline_mode = #tpu.pipeline_mode<synchronous>, transform_indices = @transform_3, window_bounds = array<i64: 1, 32>}, {pipeline_mode = #tpu.pipeline_mode<synchronous>, transform_indices = @transform_4, window_bounds = array<i64: 32, 32>}, {pipeline_mode = #tpu.pipeline_mode<synchronous>, transform_indices = @transform_5, window_bounds = array<i64: 1, 32>}, {pipeline_mode = #tpu.pipeline_mode<synchronous>, transform_indices = @transform_6, window_bounds = array<i64: 4, 32>}, {pipeline_mode = #tpu.pipeline_mode<synchronous>, transform_indices = @transform_7, window_bounds = array<i64: 4, 1>}, {pipeline_mode = #tpu.pipeline_mode<synchronous>, transform_indices = @transform_8, window_bounds = array<i64: 4, 32>}, {pipeline_mode = #tpu.pipeline_mode<synchronous>, transform_indices = @transform_9, window_bounds = array<i64: 4, 1>}, {transform_indices = @transform_10, window_bounds = array<i64: 16, 8>}]} {
    %c0 = arith.constant 0 : index
    %c0_0 = arith.constant 0 : index
    %0 = vector.load %arg1[%c0, %c0_0] : memref<8x16xf32, #tpu.memory_space<vmem>>, vector<8x16xf32>
    %c0_1 = arith.constant 0 : index
    %c0_2 = arith.constant 0 : index
    %1 = vector.load %arg3[%c0_1, %c0_2] : memref<16x32xf32, #tpu.memory_space<vmem>>, vector<16x32xf32>
    %c0_3 = arith.constant 0 : index
    %c0_4 = arith.constant 0 : index
    %2 = vector.load %arg4[%c0_3, %c0_4] : memref<1x32xf32, #tpu.memory_space<vmem>>, vector<1x32xf32>
    %cst = arith.constant dense<0.000000e+00> : vector<8x32xf32>
    %3 = tpu.matmul %0, %1, %cst {dimension_numbers = #tpu.dot_dimension_numbers<[1], [0], [0], [1], [0, 0, 1, 1], [], []>} : vector<8x16xf32>, vector<16x32xf32>, vector<8x32xf32> -> vector<8x32xf32>
    %4 = vector.broadcast %2 : vector<1x32xf32> to vector<8x32xf32>
    %5 = arith.addf %3, %4 : vector<8x32xf32>
    %cst_5 = arith.constant 0.000000e+00 : f32
    %6 = vector.broadcast %cst_5 : f32 to vector<8x32xf32>
    %7 = arith.maximumf %5, %6 : vector<8x32xf32>
    %c0_6 = arith.constant 0 : index
    %c0_7 = arith.constant 0 : index
    %8 = vector.load %arg5[%c0_6, %c0_7] : memref<32x32xf32, #tpu.memory_space<vmem>>, vector<32x32xf32>
    %c0_8 = arith.constant 0 : index
    %c0_9 = arith.constant 0 : index
    %9 = vector.load %arg6[%c0_8, %c0_9] : memref<1x32xf32, #tpu.memory_space<vmem>>, vector<1x32xf32>
    %cst_10 = arith.constant dense<0.000000e+00> : vector<8x32xf32>
    %10 = tpu.matmul %7, %8, %cst_10 {dimension_numbers = #tpu.dot_dimension_numbers<[1], [0], [0], [1], [0, 0, 1, 1], [], []>} : vector<8x32xf32>, vector<32x32xf32>, vector<8x32xf32> -> vector<8x32xf32>
    %11 = vector.broadcast %9 : vector<1x32xf32> to vector<8x32xf32>
    %12 = arith.addf %10, %11 : vector<8x32xf32>
    %cst_11 = arith.constant 0.000000e+00 : f32
    %13 = vector.broadcast %cst_11 : f32 to vector<8x32xf32>
    %14 = arith.maximumf %12, %13 : vector<8x32xf32>
    %c0_12 = arith.constant 0 : index
    %c0_13 = arith.constant 0 : index
    %15 = vector.load %arg7[%c0_12, %c0_13] : memref<4x32xf32, #tpu.memory_space<vmem>>, vector<4x32xf32>
    %cst_14 = arith.constant dense<0.000000e+00> : vector<4x8xf32>
    %16 = tpu.matmul %15, %14, %cst_14 {dimension_numbers = #tpu.dot_dimension_numbers<[1], [1], [0], [0], [0, 0, 1, 0], [], []>} : vector<4x32xf32>, vector<8x32xf32>, vector<4x8xf32> -> vector<4x8xf32>
    %c0_15 = arith.constant 0 : index
    %c0_16 = arith.constant 0 : index
    %17 = vector.load %arg8[%c0_15, %c0_16] : memref<4x1xf32, #tpu.memory_space<vmem>>, vector<4x1xf32>
    %18 = vector.broadcast %17 : vector<4x1xf32> to vector<4x8xf32>
    %19 = arith.addf %16, %18 : vector<4x8xf32>
    %c0_17 = arith.constant 0 : index
    %c0_18 = arith.constant 0 : index
    %20 = vector.load %arg9[%c0_17, %c0_18] : memref<4x32xf32, #tpu.memory_space<vmem>>, vector<4x32xf32>
    %cst_19 = arith.constant dense<0.000000e+00> : vector<4x8xf32>
    %21 = tpu.matmul %20, %14, %cst_19 {dimension_numbers = #tpu.dot_dimension_numbers<[1], [1], [0], [0], [0, 0, 1, 0], [], []>} : vector<4x32xf32>, vector<8x32xf32>, vector<4x8xf32> -> vector<4x8xf32>
    %c0_20 = arith.constant 0 : index
    %c0_21 = arith.constant 0 : index
    %22 = vector.load %arg10[%c0_20, %c0_21] : memref<4x1xf32, #tpu.memory_space<vmem>>, vector<4x1xf32>
    %23 = vector.broadcast %22 : vector<4x1xf32> to vector<4x8xf32>
    %24 = arith.addf %21, %23 : vector<4x8xf32>
    %cst_22 = arith.constant 1.000000e+00 : f32
    %25 = vector.broadcast %cst_22 : f32 to vector<4x8xf32>
    %26 = arith.subf %25, %24 : vector<4x8xf32>
    %cst_23 = arith.constant 0.000000e+00 : f32
    %27 = vector.broadcast %cst_23 : f32 to vector<4x8xf32>
    %28 = arith.maximumf %26, %27 : vector<4x8xf32>
    %29 = vector.broadcast %cst_23 : f32 to vector<4x8xf32>
    %30 = arith.subf %26, %29 : vector<4x8xf32>
    %31 = arith.cmpf one, %30, %30 : vector<4x8xf32>
    %32 = vector.broadcast %cst_23 : f32 to vector<4x8xf32>
    %33 = arith.addf %26, %32 : vector<4x8xf32>
    %34 = math.absf %30 : vector<4x8xf32>
    %cst_24 = arith.constant 0.000000e+00 : f32
    %35 = vector.broadcast %cst_24 : f32 to vector<4x8xf32>
    %36 = arith.subf %35, %34 : vector<4x8xf32>
    %37 = math.exp %36 : vector<4x8xf32>
    %38 = math.log1p %37 : vector<4x8xf32>
    %39 = arith.addf %28, %38 : vector<4x8xf32>
    %40 = arith.select %31, %33, %39 : vector<4x8xi1>, vector<4x8xf32>
    %cst_25 = arith.constant 1.000000e+00 : f32
    %41 = vector.broadcast %cst_25 : f32 to vector<4x8xf32>
    %42 = arith.subf %41, %40 : vector<4x8xf32>
    %cst_26 = arith.constant -1.000000e+01 : f32
    %43 = vector.broadcast %cst_26 : f32 to vector<4x8xf32>
    %44 = arith.subf %42, %43 : vector<4x8xf32>
    %cst_27 = arith.constant 0.000000e+00 : f32
    %45 = vector.broadcast %cst_27 : f32 to vector<4x8xf32>
    %46 = arith.maximumf %44, %45 : vector<4x8xf32>
    %47 = vector.broadcast %cst_27 : f32 to vector<4x8xf32>
    %48 = arith.subf %44, %47 : vector<4x8xf32>
    %49 = arith.cmpf one, %48, %48 : vector<4x8xf32>
    %50 = vector.broadcast %cst_27 : f32 to vector<4x8xf32>
    %51 = arith.addf %44, %50 : vector<4x8xf32>
    %52 = math.absf %48 : vector<4x8xf32>
    %cst_28 = arith.constant 0.000000e+00 : f32
    %53 = vector.broadcast %cst_28 : f32 to vector<4x8xf32>
    %54 = arith.subf %53, %52 : vector<4x8xf32>
    %55 = math.exp %54 : vector<4x8xf32>
    %56 = math.log1p %55 : vector<4x8xf32>
    %57 = arith.addf %46, %56 : vector<4x8xf32>
    %58 = arith.select %49, %51, %57 : vector<4x8xi1>, vector<4x8xf32>
    %cst_29 = arith.constant -1.000000e+01 : f32
    %59 = vector.broadcast %cst_29 : f32 to vector<4x8xf32>
    %60 = arith.addf %59, %58 : vector<4x8xf32>
    %61 = math.exp %60 : vector<4x8xf32>
    %c0_30 = arith.constant 0 : index
    %c0_31 = arith.constant 0 : index
    %62 = vector.load %arg2[%c0_30, %c0_31] : memref<4x8xf32, #tpu.memory_space<vmem>>, vector<4x8xf32>
    %63 = arith.mulf %61, %62 : vector<4x8xf32>
    %64 = arith.addf %19, %63 : vector<4x8xf32>
    %65 = arith.mulf %62, %62 : vector<4x8xf32>
    %cst_32 = arith.constant -5.000000e-01 : f32
    %66 = vector.broadcast %cst_32 : f32 to vector<4x8xf32>
    %67 = arith.mulf %66, %65 : vector<4x8xf32>
    %68 = arith.subf %67, %60 : vector<4x8xf32>
    %cst_33 = arith.constant -0.918938517 : f32
    %69 = vector.broadcast %cst_33 : f32 to vector<4x8xf32>
    %70 = arith.addf %68, %69 : vector<4x8xf32>
    %71 = math.tanh %64 : vector<4x8xf32>
    %cst_34 = arith.constant 2.500000e+00 : f32
    %72 = vector.broadcast %cst_34 : f32 to vector<4x8xf32>
    %73 = arith.mulf %71, %72 : vector<4x8xf32>
    %cst_35 = arith.constant 5.000000e-01 : f32
    %74 = vector.broadcast %cst_35 : f32 to vector<4x8xf32>
    %75 = arith.addf %73, %74 : vector<4x8xf32>
    %76 = math.tanh %19 : vector<4x8xf32>
    %cst_36 = arith.constant 2.500000e+00 : f32
    %77 = vector.broadcast %cst_36 : f32 to vector<4x8xf32>
    %78 = arith.mulf %76, %77 : vector<4x8xf32>
    %cst_37 = arith.constant 5.000000e-01 : f32
    %79 = vector.broadcast %cst_37 : f32 to vector<4x8xf32>
    %80 = arith.addf %78, %79 : vector<4x8xf32>
    %81 = arith.mulf %71, %71 : vector<4x8xf32>
    %cst_38 = arith.constant 1.000000e+00 : f32
    %82 = vector.broadcast %cst_38 : f32 to vector<4x8xf32>
    %83 = arith.subf %82, %81 : vector<4x8xf32>
    %cst_39 = arith.constant 2.500000e+00 : f32
    %84 = vector.broadcast %cst_39 : f32 to vector<4x8xf32>
    %85 = arith.mulf %84, %83 : vector<4x8xf32>
    %cst_40 = arith.constant 9.99999997E-7 : f32
    %86 = vector.broadcast %cst_40 : f32 to vector<4x8xf32>
    %87 = arith.addf %85, %86 : vector<4x8xf32>
    %88 = math.log %87 : vector<4x8xf32>
    %89 = arith.subf %70, %88 : vector<4x8xf32>
    %cst_41 = arith.constant dense<0.000000e+00> : vector<8xf32>
    %90 = vector.multi_reduction <add>, %89, %cst_41 [0] : vector<4x8xf32> to vector<8xf32>
    %91 = vector.shape_cast %90 : vector<8xf32> to vector<1x8xf32>
    %c0_42 = arith.constant 0 : index
    %c0_43 = arith.constant 0 : index
    %92 = vector.load %arg11[%c0_42, %c0_43] : memref<16x8xf32, #tpu.memory_space<vmem>>, vector<4x8xf32>
    tpu.vector_store %arg11[%c0_42, %c0_43], %75 {strides = array<i32>} : memref<16x8xf32, #tpu.memory_space<vmem>>, vector<4x8xf32>,
    %c4 = arith.constant 4 : index
    %c0_44 = arith.constant 0 : index
    %93 = vector.load %arg11[%c4, %c0_44] : memref<16x8xf32, #tpu.memory_space<vmem>>, vector<4x8xf32>
    tpu.vector_store %arg11[%c4, %c0_44], %80 {strides = array<i32>} : memref<16x8xf32, #tpu.memory_space<vmem>>, vector<4x8xf32>,
    %c8 = arith.constant 8 : index
    %c0_45 = arith.constant 0 : index
    %94 = vector.load %arg11[%c8, %c0_45] : memref<16x8xf32, #tpu.memory_space<vmem>>, vector<1x8xf32>
    tpu.vector_store %arg11[%c8, %c0_45], %91 {strides = array<i32>} : memref<16x8xf32, #tpu.memory_space<vmem>>, vector<1x8xf32>,
    %cst_46 = arith.constant 0.000000e+00 : f32
    %95 = vector.broadcast %cst_46 : f32 to vector<7x8xf32>
    %c9 = arith.constant 9 : index
    %c0_47 = arith.constant 0 : index
    %96 = vector.load %arg11[%c9, %c0_47] : memref<16x8xf32, #tpu.memory_space<vmem>>, vector<7x8xf32>
    tpu.vector_store %arg11[%c9, %c0_47], %95 {strides = array<i32>} : memref<16x8xf32, #tpu.memory_space<vmem>>, vector<7x8xf32>,
    return
  }
  func.func @transform_0(%arg0: i32) -> (i32, i32) {
    %c0_i32 = arith.constant 0 : i32
    %c0_i32_0 = arith.constant 0 : i32
    return %arg0, %c0_i32 : i32, i32
  }
  func.func @transform_1(%arg0: i32) -> (i32, i32) {
    %c0_i32 = arith.constant 0 : i32
    %c0_i32_0 = arith.constant 0 : i32
    return %c0_i32, %arg0 : i32, i32
  }
  func.func @transform_2(%arg0: i32) -> (i32, i32) {
    %c0_i32 = arith.constant 0 : i32
    %c0_i32_0 = arith.constant 0 : i32
    %c0_i32_1 = arith.constant 0 : i32
    return %c0_i32, %c0_i32_0 : i32, i32
  }
  func.func @transform_3(%arg0: i32) -> (i32, i32) {
    %c0_i32 = arith.constant 0 : i32
    %c0_i32_0 = arith.constant 0 : i32
    %c0_i32_1 = arith.constant 0 : i32
    return %c0_i32, %c0_i32_0 : i32, i32
  }
  func.func @transform_4(%arg0: i32) -> (i32, i32) {
    %c0_i32 = arith.constant 0 : i32
    %c0_i32_0 = arith.constant 0 : i32
    %c0_i32_1 = arith.constant 0 : i32
    return %c0_i32, %c0_i32_0 : i32, i32
  }
  func.func @transform_5(%arg0: i32) -> (i32, i32) {
    %c0_i32 = arith.constant 0 : i32
    %c0_i32_0 = arith.constant 0 : i32
    %c0_i32_1 = arith.constant 0 : i32
    return %c0_i32, %c0_i32_0 : i32, i32
  }
  func.func @transform_6(%arg0: i32) -> (i32, i32) {
    %c0_i32 = arith.constant 0 : i32
    %c0_i32_0 = arith.constant 0 : i32
    %c0_i32_1 = arith.constant 0 : i32
    return %c0_i32, %c0_i32_0 : i32, i32
  }
  func.func @transform_7(%arg0: i32) -> (i32, i32) {
    %c0_i32 = arith.constant 0 : i32
    %c0_i32_0 = arith.constant 0 : i32
    %c0_i32_1 = arith.constant 0 : i32
    return %c0_i32, %c0_i32_0 : i32, i32
  }
  func.func @transform_8(%arg0: i32) -> (i32, i32) {
    %c0_i32 = arith.constant 0 : i32
    %c0_i32_0 = arith.constant 0 : i32
    %c0_i32_1 = arith.constant 0 : i32
    return %c0_i32, %c0_i32_0 : i32, i32
  }
  func.func @transform_9(%arg0: i32) -> (i32, i32) {
    %c0_i32 = arith.constant 0 : i32
    %c0_i32_0 = arith.constant 0 : i32
    %c0_i32_1 = arith.constant 0 : i32
    return %c0_i32, %c0_i32_0 : i32, i32
  }
  func.func @transform_10(%arg0: i32) -> (i32, i32) {
    %c0_i32 = arith.constant 0 : i32
    %c0_i32_0 = arith.constant 0 : i32
    return %c0_i32, %arg0 : i32, i32
  }
}

</mosaic_0001>

<bundles_post_ra>
// kernel: tpu_custom_call.1
= control target key start
LH: loop header
LB: loop body
LE: loop exit
PB: predicated region body
PF: predicated region fallthrough
CT: control target
= control target key end

     0   :  { %15 = vsyncpa [#allocation3], 0  ;;  %s790_s0 = inlined_call_operand.hbm [shape: f32[8,16], index: 0, kind: input, shape index: {}]   ;;  %s791_s1 = inlined_call_operand.hbm [shape: f32[4,8], index: 1, kind: input, shape index: {}]   ;;  %s792_s2 = inlined_call_operand.vmem [shape: f32[16,32], index: 2, kind: input, shape index: {}]   ;;  %s793_s3 = inlined_call_operand.vmem [shape: f32[1,32], index: 3, kind: input, shape index: {}]   ;;  %s794_s4 = inlined_call_operand.hbm [shape: f32[32,32], index: 4, kind: input, shape index: {}]   ;;  %s795_s5 = inlined_call_operand.vmem [shape: f32[1,32], index: 5, kind: input, shape index: {}]   ;;  %s796_s6 = inlined_call_operand.vmem [shape: f32[4,32], index: 6, kind: input, shape index: {}]   ;;  %s797_s7 = inlined_call_operand.vmem [shape: f32[4,1], index: 7, kind: input, shape index: {}]   ;;  %s798_s8 = inlined_call_operand.vmem [shape: f32[4,32], index: 8, kind: input, shape index: {}]   ;;  %s799_s9 = inlined_call_operand.vmem [shape: f32[4,1], index: 9, kind: input, shape index: {}]   ;;  %s800_s10 = inlined_call_operand.vmem [shape: f32[16,8], index: 10, kind: output, shape index: {}]  }
   0x1   :  { %16 = vsyncpa [#allocation5], 0  ;;  %s642_s13 = smov [#allocation4]   ;;  %s643_s15 = smov [#allocation2]  }
   0x2   :  { %s33_s14 = sshll.u32 %s642_s13, 4  ;;  %s23_s16 = sshll.u32 %s643_s15, 4  ;;  %s34_s14 = int_to_ptr.vmem [resolvable:$true] %s33_s14  ;;  %s24_s16 = int_to_ptr.vmem [resolvable:$true] %s23_s16 }
   0x3   :  { %s572_s19 = scalar_lea.hbm %s791_s1, 64 }
   0x4   :  { %p573_p0 = scmp.ne.s32.totalorder %s791_s1, %s572_s19  ;;  %p576_p1 = scmp.lt.u32.totalorder %s572_s19, %s791_s1 }
   0x6   :  { %p578_p2 = pnand %p576_p1, %p573_p0 }
   0x8   :  { %581 = shalt.err (!%p578_p2)
}
   0x9   :  { %s582_s24 = scalar_lea.vmem %s34_s14, 64  ;;  %p587_p4 = scmp.lt.s32.totalorder %s34_s14, %s34_s14 }
   0xa   :  { %p583_p3 = scmp.ne.s32.totalorder %s34_s14, %s582_s24  ;;  %p588_p5 = scmp.lt.s32.totalorder %s582_s24, %s582_s24 }
   0xc   :  { %p589_p6 = por %p588_p5, %p587_p4 }
   0xe   :  { %p590_p7 = pnand %p589_p6, %p583_p3 }
  0x10   :  { %593 = shalt.err (!%p590_p7)
}
  0x11   :  { %36 = dma.hbm_to_vmem [thread:$0]  %s791_s1, 64, %s34_s14, [#allocation5]  }
  0x12   :  { %s594_s29 = scalar_lea.hbm %s790_s0, 128 }
  0x13   :  { %p595_p8 = scmp.ne.s32.totalorder %s790_s0, %s594_s29  ;;  %p598_p9 = scmp.lt.u32.totalorder %s594_s29, %s790_s0 }
  0x15   :  { %p600_p10 = pnand %p598_p9, %p595_p8 }
  0x17   :  { %603 = shalt.err (!%p600_p10)
}
  0x18   :  { %s604_s15 = scalar_lea.vmem %s24_s16, 128  ;;  %p609_p12 = scmp.lt.s32.totalorder %s24_s16, %s24_s16 }
  0x19   :  { %p605_p11 = scmp.ne.s32.totalorder %s24_s16, %s604_s15  ;;  %p610_p13 = scmp.lt.s32.totalorder %s604_s15, %s604_s15 }
  0x1b   :  { %p611_p0 = por %p610_p13, %p609_p12 }
  0x1d   :  { %p612_p1 = pnand %p611_p0, %p605_p11 }
  0x1f   :  { %615 = shalt.err (!%p612_p1)
}
  0x20   :  { %26 = dma.hbm_to_vmem [thread:$0]  %s790_s0, 128, %s24_s16, [#allocation3]  }
  0x21   :  { %s644_s17 = smov [#allocation6]   ;;  %s616_s21 = scalar_lea.hbm %s794_s4, 512 }
  0x22   :  { %s46_s18 = sshll.u32 %s644_s17, 4  ;;  %p617_p2 = scmp.ne.s32.totalorder %s794_s4, %s616_s21  ;;  %s47_s18 = int_to_ptr.vmem [resolvable:$true] %s46_s18 }
  0x23   :  { %p620_p3 = scmp.lt.u32.totalorder %s616_s21, %s794_s4 }
  0x25   :  { %p622_p4 = pnand %p620_p3, %p617_p2 }
  0x27   :  { %625 = shalt.err (!%p622_p4)
}
  0x28   :  { %s626_s26 = scalar_lea.vmem %s47_s18, 512  ;;  %p631_p6 = scmp.lt.s32.totalorder %s47_s18, %s47_s18 }
  0x29   :  { %p627_p5 = scmp.ne.s32.totalorder %s47_s18, %s626_s26  ;;  %p632_p7 = scmp.lt.s32.totalorder %s626_s26, %s626_s26 }
  0x2b   :  { %p633_p8 = por %p632_p7, %p631_p6 }
  0x2d   :  { %p634_p9 = pnand %p633_p8, %p627_p5 }
  0x2f   :  { %637 = shalt.err (!%p634_p9)
}
  0x30   :  { %s645_s0 = smov 128   ;;  %s646_s16 = smov 8  }
  0x31   :  { %52 = dma.hbm_to_vmem [thread:$0]  %s794_s4, 512, %s47_s18, [#allocation5], %s645_s0, %s645_s0, %s646_s16  }
  0x32   :  { %638 = dma.done.wait [#allocation3], 128  }
  0x33   :  { %639 = vsyncadd [#allocation3], 4294967168 }
  0x34   :  { %640 = dma.done.wait [#allocation5], 576  }
  0x35   :  { %641 = vsyncadd [#allocation5], 4294966720  ;;  %vm480_vm0 = vcmask 63488   ;;  %v647_v0 = vmov 0.0|0.0   ;;  %vm648_vm1 = vmmov 0   ;;  %v649_v1 = vmov 0.0  }
  0x36   :  { %537 = vmatprep.subr.bf16.mxu0 %v647_v0  ;;  %513 = vmatprep.mubr.msk.f32.mxu0 %vm648_vm1, %v649_v1  ;;  %481 = vst.msk [vmem:[%s800_s10 + $0x9] sm:$0x7f] %vm480_vm0, %v649_v1  ;;  %v73_v2 = vld [vmem:[%s792_s2] sm:$0xff]  ;;  %v74_v3 = vld [vmem:[%s792_s2 + $0x8] sm:$0xff]  ;;  %v158_v6 = vld [vmem:[#allocation6 + $0x8] sm:$0xff]  ;;  %vm82_vm2 = vcmask 130048  }
  0x37   :  { %540 = vmatprep.subr.bf16.mxu1 %v647_v0  ;;  %524 = vmatprep.mubr.msk.f32.mxu1 %vm648_vm1, %v649_v1  ;;  %v538_v4 = vpack.c.bf16 %v74_v3, %v73_v2  ;;  %v157_v5 = vld [vmem:[#allocation6] sm:$0xff]  ;;  %v72_v8 = vld [vmem:[#allocation2] sm:$0xff]  ;;  %vm168_vm3 = vcmask 261120   ;;  %v650_v18 = vmov 0   ;;  %vm468_vm4 = vcmask 60416  }
  0x38   :  { %v541_v7 = vpack.c.bf16 %v158_v6, %v157_v5  ;;  %v159_v9 = vld [vmem:[#allocation6 + $0x10] sm:$0xff]  ;;  %v160_v10 = vld [vmem:[#allocation6 + $0x18] sm:$0xff]  ;;  %555 = vset.pattern.permute.xlu0 %v650_v18  ;;  %vm478_vm9 = vcmask 57344  }
  0x39   :  { %539 = vmatpush3.bf16.msra.mxu0 %v538_v4  ;;  %v544_v11 = vpack.c.bf16 %v160_v10, %v159_v9  ;;  %v488_v12 = vld [vmem:[%s793_s3] ss:$0 sm:$0xff]  ;;  %v448_v10 = vld [vmem:[#allocation4] sm:$0xf] }
  0x3a   :  { %542 = vmatpush3.bf16.msra.mxu1 %v541_v7  ;;  %527 = vmatprep.subr.mxu0 %v649_v1  ;;  %v327_v17 = vld [vmem:[%s799_s9] sm:$0xf] }
  0x3b   :  { %543 = vmatprep.subr.bf16.mxu1 %v647_v0  ;;  %330 = vperm.xlu0 %555, %v327_v17   ;;  %v244_v19 = vld [vmem:[%s797_s7] sm:$0xf] }
  0x3c   :  { %514 = vmatmul.mubr.msk.f32.vlgmr.msra.gmra.mrb[0].mxu0 %vm82_vm2, %v72_v8  ;;  %v490_v20 = vld [vmem:[%s795_s5] ss:$0 sm:$0xff] }
  0x3d   :  { %529 = vmatprep.mubr.msk.f32.mxu0 %vm648_vm1, %v649_v1  ;;  %v243_v25 = vld [vmem:[%s796_s6] sm:$0xf] }
  0x3e   :  { %545 = vmatpush3.bf16.msra.mxu1 %v544_v11  ;;  %v326_v26 = vld [vmem:[%s798_s8] sm:$0xf] }
  0x3f   :  { %247 = vperm.xlu0 %555, %v244_v19  }
  0xba   :  { %v331_v27 = vpop.permute.xlu0 %330 }
  0xbe   :  { %v248_v28 = vpop.permute.xlu0 %247 }
 0x10f   :  { %v152_v13 = vpop.f32.mrb[0].mxu0 }
 0x110   :  { %v153_v14 = vadd.f32 %v488_v12, %v152_v13  ;;  %v515_v15 = vpop.f32.mrb[1].mxu0 }
 0x112   :  { %v156_v16 = vmax.f32 %v153_v14, 0.0 }
 0x114   :  { %525 = vmatmul.mubr.msk.f32.vlgmr.msra.gmra.mrb[0].mxu1 %vm168_vm3, %v156_v16 }
 0x1e7   :  { %v238_v21 = vpop.f32.mrb[0].mxu1 }
 0x1e8   :  { %v239_v22 = vadd.f32 %v490_v20, %v238_v21  ;;  %v526_v23 = vpop.f32.mrb[1].mxu1  ;;  %v451_v20 = vmul.f32 %v448_v10, %v448_v10 }
 0x1ea   :  { %v242_v24 = vmax.f32 %v239_v22, 0.0  ;;  %v452_v21 = vmul.f32 -0.5, %v451_v20 }
 0x1ec   :  { %528 = vmatpush3.xpose.msk.msra.mxu0 %vm168_vm3, %v242_v24 }
 0x1ed   :  { %532 = vmatprep.subr.mxu0 %v649_v1 }
 0x1ef   :  { %530 = vmatmul.mubr.msk.f32.vlgmr.msra.gmra.mrb[2].mxu0 %vm168_vm3, %v243_v25 }
 0x1f0   :  { %533 = vmatpush3.xpose.msk.msra.mxu0 %vm168_vm3, %v242_v24  ;;  %534 = vmatprep.mubr.msk.f32.mxu0 %vm648_vm1, %v649_v1 }
 0x1f3   :  { %535 = vmatmul.mubr.msk.f32.vlgmr.msra.gmra.mrb[4].mxu0 %vm168_vm3, %v326_v26 }
 0x2c2   :  { %v322_v29 = vpop.f32.mrb[2].mxu0 }
 0x2c3   :  { %v323_v30 = vadd.f32 %v322_v29, %v248_v28  ;;  %v531_v31 = vpop.f32.mrb[3].mxu0 }
 0x2c5   :  { %556 = vtanh.f32 %v323_v30 }
 0x2c6   :  { %v402_v32 = vpop.f32.mrb[4].mxu0 }
 0x2c7   :  { %v403_v33 = vadd.f32 %v402_v32, %v331_v27  ;;  %v536_v34 = vpop.f32.mrb[5].mxu0 }
 0x2c9   :  { %v406_v35 = vsub.f32 1.0, %v403_v33 }
 0x2cb   :  { %v410_v36 = vand.u32 2147483647, %v406_v35  ;;  %v407_v50 = vmax.f32 %v406_v35, 0.0  ;;  %vm408_vm6 = vcmp.ne.f32.partialorder %v406_v35, %v406_v35 }
 0x2cd   :  { %v411_v37 = vsub.f32 0.0, %v410_v36 }
 0x2cf   :  { %v557_v38 = vpop.eup %556  ;;  %v412_v39 = vmul.f32 1.442695, %v411_v37 }
 0x2d0   :  { %v459_v40 = vmul.f32 2.5, %v557_v38 }
 0x2d1   :  { %558 = vpow2.f32 %v412_v39 }
 0x2d2   :  { %v460_v41 = vadd.f32 0.5, %v459_v40 }
 0x2d4   :  { %477 = vst.msk [vmem:[%s800_s10 + $0x4] sm:$0xf] %vm468_vm4, %v460_v41 }
 0x2db   :  { %v559_v42 = vpop.eup %558 }
 0x2dc   :  { %v414_v43 = vadd.f32 1.0, %v559_v42  ;;  %v417_v44 = vmul.f32 -0.5, %v559_v42  ;;  %v420_v46 = vand.u32 2147483647, %v559_v42 }
 0x2de   :  { %560 = vlog2.f32 %v414_v43  ;;  %v418_v45 = vadd.f32 1.0, %v417_v44  ;;  %vm421_vm5 = vcmp.lt.f32.partialorder %v420_v46, 0.0004427343 }
 0x2e0   :  { %v419_v49 = vmul.f32 %v559_v42, %v418_v45 }
 0x2e8   :  { %v561_v47 = vpop.eup %560 }
 0x2e9   :  { %v416_v48 = vmul.f32 0.6931472, %v561_v47 }
 0x2eb   :  { %v422_v51 = vsel %vm421_vm5, %v419_v49, %v416_v48 }
 0x2ec   :  { %v423_v52 = vadd.f32 %v422_v51, %v407_v50 }
 0x2ee   :  { %v424_v53 = vsel %vm408_vm6, %v406_v35, %v423_v52 }
 0x2ef   :  { %v425_v54 = vsub.f32 1.0, %v424_v53 }
 0x2f1   :  { %v496_v55 = vadd.f32 10.0, %v425_v54 }
 0x2f3   :  { %v430_v56 = vand.u32 2147483647, %v496_v55  ;;  %v427_v3 = vmax.f32 %v496_v55, 0.0  ;;  %vm428_vm8 = vcmp.ne.f32.partialorder %v496_v55, %v496_v55 }
 0x2f5   :  { %v431_v57 = vsub.f32 0.0, %v430_v56 }
 0x2f7   :  { %v432_v58 = vmul.f32 1.442695, %v431_v57 }
 0x2f9   :  { %562 = vpow2.f32 %v432_v58 }
 0x303   :  { %v563_v59 = vpop.eup %562 }
 0x304   :  { %v434_v60 = vadd.f32 1.0, %v563_v59  ;;  %v437_v61 = vmul.f32 -0.5, %v563_v59  ;;  %v440_v63 = vand.u32 2147483647, %v563_v59 }
 0x306   :  { %564 = vlog2.f32 %v434_v60  ;;  %v438_v62 = vadd.f32 1.0, %v437_v61  ;;  %vm441_vm7 = vcmp.lt.f32.partialorder %v440_v63, 0.0004427343 }
 0x308   :  { %v439_v2 = vmul.f32 %v563_v59, %v438_v62 }
 0x310   :  { %v565_v0 = vpop.eup %564 }
 0x311   :  { %v436_v1 = vmul.f32 0.6931472, %v565_v0 }
 0x313   :  { %v442_v4 = vsel %vm441_vm7, %v439_v2, %v436_v1 }
 0x314   :  { %v443_v5 = vadd.f32 %v442_v4, %v427_v3 }
 0x316   :  { %v444_v6 = vsel %vm428_vm8, %v496_v55, %v443_v5 }
 0x317   :  { %v445_v7 = vadd.f32 -10.0, %v444_v6 }
 0x319   :  { %v446_v8 = vmul.f32 1.442695, %v445_v7  ;;  %v453_v22 = vsub.f32 %v452_v21, %v445_v7 }
 0x31b   :  { %566 = vpow2.f32 %v446_v8  ;;  %v454_v24 = vadd.f32 -0.9189385, %v453_v22 }
 0x325   :  { %v567_v9 = vpop.eup %566 }
 0x326   :  { %v449_v11 = vmul.f32 %v567_v9, %v448_v10 }
 0x328   :  { %v450_v12 = vadd.f32 %v449_v11, %v323_v30 }
 0x32a   :  { %568 = vtanh.f32 %v450_v12 }
 0x334   :  { %v569_v13 = vpop.eup %568 }
 0x335   :  { %v456_v14 = vmul.f32 2.5, %v569_v13  ;;  %v461_v15 = vmul.f32 %v569_v13, %v569_v13 }
 0x337   :  { %v457_v16 = vadd.f32 0.5, %v456_v14  ;;  %v462_v17 = vsub.f32 1.0, %v461_v15 }
 0x339   :  { %v463_v18 = vmul.f32 2.5, %v462_v17  ;;  %476 = vst.msk [vmem:[%s800_s10] sm:$0xf] %vm468_vm4, %v457_v16 }
 0x33b   :  { %v464_v19 = vadd.f32 1e-06, %v463_v18 }
 0x33d   :  { %570 = vlog2.f32 %v464_v19 }
 0x347   :  { %v571_v23 = vpop.eup %570 }
 0x348   :  { %v466_v25 = vmul.f32 0.6931472, %v571_v23 }
 0x34a   :  { %v467_v26 = vsub.f32 %v454_v24, %v466_v25 }
 0x34c   :  { %v469_v27 = vsel %vm468_vm4, %v467_v26, 0.0 }
 0x34d   :  { %v470_v28 = vrot.slane %v469_v27, 4 }
 0x34f   :  { %v471_v29 = vadd.f32 %v470_v28, %v469_v27 }
 0x351   :  { %v472_v30 = vrot.slane %v471_v29, 2 }
 0x353   :  { %v473_v31 = vadd.f32 %v472_v30, %v471_v29 }
 0x355   :  { %v474_v32 = vrot.slane %v473_v31, 1 }
 0x357   :  { %v475_v33 = vadd.f32 %v474_v32, %v473_v31 }
 0x359   :  { %479 = vst.msk [vmem:[%s800_s10 + $0x8] sm:$0x1] %vm478_vm9, %v475_v33 }
 0x35a   :  { %486 = vsyncpa [#allocation3], 1 }
 0x35b   :  { %487 = vsyncpa [#allocation5], 1 }

</bundles_post_ra>
